<compile_context>
chip_gen: v7x
topology: tpu7x:2x2x1
jax: 0.10.0
libtpu: 0.0.40
codegen_flags: <defaults>
</compile_context>

<pallas_src>
import math

import jax
import jax.numpy as jnp
from jax import lax
from jax.experimental import pallas as pl
from jax.experimental.pallas import tpu as pltpu


def temporal_decay_kernel(d_ref, w_ref, b_ref, o_ref):
    # d_ref: (tm, F), w_ref: (F, F) [NOT transposed], b_ref: (1, F)
    # Contract d's axis 1 with W's axis 1  ->  d @ W.T  (matches F.linear).
    z = lax.dot_general(
        d_ref[...], w_ref[...],
        dimension_numbers=(((1,), (1,)), ((), ())),
        preferred_element_type=jnp.float32,
    )
    z = z + b_ref[...].astype(jnp.float32)        # bias broadcast over rows (VPU)
    gamma = jnp.maximum(z, 0.0)                   # relu (VPU)
    o_ref[...] = jnp.exp(-gamma).astype(o_ref.dtype)   # exp on the EUP slot


def _round_up(x, m):
    return (x + m - 1) // m * m


# Buffer budget that fits v7x's 64 MiB physical VMEM with headroom and is
# conservative on v5e/v6e (128 MiB).
_VMEM_SAFE_BUDGET = 48 * 1024 * 1024


def _choose_row_tile(n_rows, feat, itemsize, row_tile):
    """Pick the row tile: big, multiple of 8, minimal waste, >=2 grid steps
    when there is enough work (so v7x can shard the batch axis across its 2
    TensorCores), and within the VMEM budget."""
    fixed = feat * feat * itemsize + feat * itemsize      # W + b, single-buffered
    per_row = 2 * 2 * feat * itemsize                     # d + out, double-buffered
    avail = max(_VMEM_SAFE_BUDGET - fixed, 1 << 20)
    max_rows = max(8, (avail // per_row) // 8 * 8)
    row_tile = max(8, min(row_tile, max_rows))

    n_tiles = pl.cdiv(n_rows, row_tile)
    if n_rows > 16 and n_tiles < 2:
        n_tiles = 2                                       # give both v7x TCs work
    tm = _round_up(max(pl.cdiv(n_rows, n_tiles), 1), 8)
    vmem_bytes = fixed + tm * per_row
    return tm, vmem_bytes


def temporal_decay(d, W, b, *, row_tile=1024):
    """gamma = exp(-relu(d @ W.T + b)) — matches the PyTorch TemporalDecay.

    d may have arbitrary leading dims (e.g. (T, B, F)); they are folded into a
    single row axis so one pallas_call covers the whole tensor. No feature or
    parameter padding is performed.
    """
    F = W.shape[0]
    orig_shape = d.shape
    d2 = d.reshape(-1, F)                  # fold time/batch dims -> (N, F)
    N = d2.shape[0]
    b2 = b.reshape(1, F)                   # 2-D for a clean (1, F) VMEM block

    itemsize = jnp.dtype(d.dtype).itemsize
    w_itemsize = jnp.dtype(W.dtype).itemsize
    tm, vmem_bytes = _choose_row_tile(N, F, itemsize, row_tile)
    grid = (pl.cdiv(N, tm),)

    # True per-call HBM traffic / work (unpadded shapes, actual dtypes).
    cost = pl.CostEstimate(
        flops=2 * N * F * F,
        transcendentals=N * F,
        bytes_accessed=itemsize * (2 * N * F) + w_itemsize * (F * F + F),
    )

    out = pl.pallas_call(
        temporal_decay_kernel,
        out_shape=jax.ShapeDtypeStruct((N, F), d.dtype),
        grid_spec=pltpu.PrefetchScalarGridSpec(
            num_scalar_prefetch=0,
            grid=grid,
            in_specs=[
                # d tiles stream through the default double-buffered pipeline.
                pl.BlockSpec((tm, F), lambda i: (i, 0)),
                # W and b are grid-invariant -> single buffer (no dead copy).
                pl.BlockSpec((F, F), lambda i: (0, 0),
                             pipeline_mode=pl.Buffered(1)),
                pl.BlockSpec((1, F), lambda i: (0, 0),
                             pipeline_mode=pl.Buffered(1)),
            ],
            out_specs=pl.BlockSpec((tm, F), lambda i: (i, 0)),
        ),
        compiler_params=pltpu.CompilerParams(
            dimension_semantics=("parallel",),            # megacore-shardable
            vmem_limit_bytes=int(min(max(2 * vmem_bytes, 32 * 1024 * 1024),
                                     64 * 1024 * 1024)),  # safe on v5e/v6e/v7x
        ),
        cost_estimate=cost,
    )(d2, W, b2)

    return out.reshape(orig_shape)


if __name__ == "__main__":
    # Small shapes implied by the module: d is (time, batch, input_size) —
    # exercising the timestep fold into a single pallas_call.
    T, batch, input_size = 6, 8, 32

    key = jax.random.PRNGKey(0)
    k_d, k_w, k_b = jax.random.split(key, 3)

    # Parameter init mirroring reset_parameters(): uniform(-stdv, stdv)
    stdv = 1.0 / math.sqrt(input_size)
    W = jax.random.uniform(k_w, (input_size, input_size),
                           minval=-stdv, maxval=stdv, dtype=jnp.float32)
    b = jax.random.uniform(k_b, (input_size,),
                           minval=-stdv, maxval=stdv, dtype=jnp.float32)

    # Example input: time-delta-like non-negative values
    d = jax.random.uniform(k_d, (T, batch, input_size),
                           minval=0.0, maxval=5.0, dtype=jnp.float32)

    fn = jax.jit(temporal_decay)
    gamma = jax.block_until_ready(fn(d, W, b))

    # Reference check (plain JAX)
    ref = jnp.exp(-jnp.maximum(
        jnp.einsum("tbf,gf->tbg", d, W) + b, 0.0))
    assert gamma.shape == (T, batch, input_size)
    assert jnp.allclose(gamma, ref, atol=1e-5, rtol=1e-5)

    print("KERNEL_OK")
</pallas_src>

<mosaic_0001>
module attributes {stable_mosaic.version = 11 : i64} {
  func.func @temporal_decay_kernel(%arg0: i32, %arg1: memref<24x32xf32, #tpu.memory_space<vmem>>, %arg2: memref<32x32xf32, #tpu.memory_space<vmem>>, %arg3: memref<1x32xf32, #tpu.memory_space<vmem>>, %arg4: memref<24x32xf32, #tpu.memory_space<vmem>>) attributes {dimension_semantics = [#tpu.dimension_semantics<parallel>], iteration_bounds = array<i64: 2>, scalar_prefetch = 0 : i64, scratch_operands = 0 : i64, tpu.core_type = #tpu.core_type<tc>, window_params = [{transform_indices = @transform_0, window_bounds = array<i64: 24, 32>}, {pipeline_mode = #tpu.pipeline_mode<synchronous>, transform_indices = @transform_1, window_bounds = array<i64: 32, 32>}, {pipeline_mode = #tpu.pipeline_mode<synchronous>, transform_indices = @transform_2, window_bounds = array<i64: 1, 32>}, {transform_indices = @transform_3, window_bounds = array<i64: 24, 32>}]} {
    %c0 = arith.constant 0 : index
    %c0_0 = arith.constant 0 : index
    %0 = vector.load %arg1[%c0, %c0_0] : memref<24x32xf32, #tpu.memory_space<vmem>>, vector<24x32xf32>
    %c0_1 = arith.constant 0 : index
    %c0_2 = arith.constant 0 : index
    %1 = vector.load %arg2[%c0_1, %c0_2] : memref<32x32xf32, #tpu.memory_space<vmem>>, vector<32x32xf32>
    %cst = arith.constant dense<0.000000e+00> : vector<24x32xf32>
    %2 = tpu.matmul %0, %1, %cst {dimension_numbers = #tpu.dot_dimension_numbers<[1], [1], [0], [0], [0, 0, 1, 0], [], []>} : vector<24x32xf32>, vector<32x32xf32>, vector<24x32xf32> -> vector<24x32xf32>
    %c0_3 = arith.constant 0 : index
    %c0_4 = arith.constant 0 : index
    %3 = vector.load %arg3[%c0_3, %c0_4] : memref<1x32xf32, #tpu.memory_space<vmem>>, vector<1x32xf32>
    %4 = vector.broadcast %3 : vector<1x32xf32> to vector<24x32xf32>
    %5 = arith.addf %2, %4 : vector<24x32xf32>
    %cst_5 = arith.constant 0.000000e+00 : f32
    %6 = vector.broadcast %cst_5 : f32 to vector<24x32xf32>
    %7 = arith.maximumf %5, %6 : vector<24x32xf32>
    %cst_6 = arith.constant 0.000000e+00 : f32
    %8 = vector.broadcast %cst_6 : f32 to vector<24x32xf32>
    %9 = arith.subf %8, %7 : vector<24x32xf32>
    %10 = math.exp %9 : vector<24x32xf32>
    %c0_7 = arith.constant 0 : index
    %c0_8 = arith.constant 0 : index
    %11 = vector.load %arg4[%c0_7, %c0_8] : memref<24x32xf32, #tpu.memory_space<vmem>>, vector<24x32xf32>
    tpu.vector_store %arg4[%c0_7, %c0_8], %10 {strides = array<i32>} : memref<24x32xf32, #tpu.memory_space<vmem>>, vector<24x32xf32>,
    return
  }
  func.func @transform_0(%arg0: i32) -> (i32, i32) {
    %c0_i32 = arith.constant 0 : i32
    %c0_i32_0 = arith.constant 0 : i32
    return %arg0, %c0_i32 : i32, i32
  }
  func.func @transform_1(%arg0: i32) -> (i32, i32) {
    %c0_i32 = arith.constant 0 : i32
    %c0_i32_0 = arith.constant 0 : i32
    %c0_i32_1 = arith.constant 0 : i32
    return %c0_i32, %c0_i32_0 : i32, i32
  }
  func.func @transform_2(%arg0: i32) -> (i32, i32) {
    %c0_i32 = arith.constant 0 : i32
    %c0_i32_0 = arith.constant 0 : i32
    %c0_i32_1 = arith.constant 0 : i32
    return %c0_i32, %c0_i32_0 : i32, i32
  }
  func.func @transform_3(%arg0: i32) -> (i32, i32) {
    %c0_i32 = arith.constant 0 : i32
    %c0_i32_0 = arith.constant 0 : i32
    return %arg0, %c0_i32 : i32, i32
  }
}

</mosaic_0001>

<bundles_post_ra>
// kernel: temporal_decay.1
= control target key start
LH: loop header
LB: loop body
LE: loop exit
PB: predicated region body
PF: predicated region fallthrough
CT: control target
= control target key end

     0   :  { %8 = vsyncpa [#allocation3], 0  ;;  %s952_s0 = inlined_call_operand.hbm [shape: f32[48,32], index: 0, kind: input, shape index: {}]   ;;  %s953_s1 = inlined_call_operand.hbm [shape: f32[32,32], index: 1, kind: input, shape index: {}]   ;;  %s954_s2 = inlined_call_operand.vmem [shape: f32[1,32], index: 2, kind: input, shape index: {}]   ;;  %s955_s3 = inlined_call_operand.hbm [shape: f32[48,32], index: 3, kind: output, shape index: {}]  }
   0x1   :  { %10 = vsyncpa [#allocation3 + $0x1], 0 }
   0x2   :  { %11 = vsyncpa [#allocation6], 0 }
   0x3   :  { %12 = vsyncpa [#allocation4], 0 }
   0x4   :  { %14 = vsyncpa [#allocation4 + $0x1], 0  ;;  %s722_s12 = smov 0   ;;  %s724_s13 = smov 0  }
   0x5   :  { %s726_s14 = smov 0   ;;  %s728_s15 = smov 0  }
   0x6 LB: > { %s743_s16 = sadd.s32 4294967295, %s690_s15   ;;  %s434_s17 = sadd.s32 4294967294, %s690_s15   ;;  %s690_s15 = sphi %s728_s15, %s975_s15   ;;  %s686_s14 = sphi %s726_s14, %s974_s14   ;;  %s682_s13 = sphi %s724_s13, %s973_s13   ;;  %s678_s12 = sphi %s722_s12, %s972_s12  }
   0x7   : > { %p40_p0 = scmp.ne.s32.totalorder %s682_s13, %s678_s12  ;;  %p956_p1 = scmp.eq.s32.totalorder %s743_s16, 0 }
   0x8   : > { %p112_p3 = scmp.eq.s32.totalorder %s434_s17, 1  ;;  %p435_p5 = scmp.ge.s32.totalorder %s690_s15, 1 }
   0x9   : > { %p752_p4 = por %p956_p1, %p40_p0  ;;  %p119_p7 = scmp.lt.s32.totalorder %s690_s15, 3 }
   0xa   : > { %p757_p6 = por %p112_p3, %p40_p0  ;;  %s692_s21 = smov [#allocation5]  }
   0xb   : > { %s959_s18 = scalar_select %p752_p4, 1, 0 }
   0xc   : > { %s960_s19 = scalar_select %p757_p6, 1, 0 }
   0xd   : > { %p762_p8 = pnand %p435_p5, %p119_p7  ;;  %s131_s22 = sshll.u32 %s692_s21, 4  ;;  %s766_s22 = int_to_ptr.vmem [resolvable:$true] %s131_s22 }
   0xe   : > { %s778_s24 = sadd.s32 1, %s690_s15   ;;  %s27_s25 = sadd.s32 1, %s686_s14 }
   0xf   : > { %s961_s20 = scalar_select %p762_p8, 1, 0 }
  0x10   : > { %p500_p9 = pneg %p762_p8  ;;  %s24_s26 = ssub.s32 %s690_s15, %s778_s24 }
  0x11   : > { %s562_s29 = scalar_lea.hbm %s953_s1, 512 }
  0x12   : > { %p773_p11 = pnand %p500_p9, %p956_p1  ;;  %p563_p12 = scmp.ne.s32.totalorder %s953_s1, %s562_s29 }
  0x13   : > { %p569_p5 = scmp.lt.u32.totalorder %s562_s29, %s953_s1 }
  0x14   : > { %p564_p13 = pneg %p773_p11 }
  0x16   : > { %p565_p0 = pnand %p564_p13, %p563_p12 }
  0x18   : > { %p566_p3 = pneg %p565_p0 }
  0x1a   : > { %p571_p7 = pnand %p569_p5, %p566_p3 }
  0x1c   : > { %574 = shalt.err (!%p571_p7)
}
  0x1d   : > { %s575_s7 = scalar_lea.vmem %s766_s22, 512  ;;  %p583_p2 = scmp.lt.s32.totalorder %s766_s22, %s766_s22 }
  0x1e   : > { %p576_p9 = scmp.ne.s32.totalorder %s766_s22, %s575_s7  ;;  %p584_p6 = scmp.lt.s32.totalorder %s575_s7, %s575_s7 }
  0x20   : > { %p578_p10 = pnand %p576_p9, %p564_p13  ;;  %p585_p4 = por %p584_p6, %p583_p2 }
  0x22   : > { %p579_p1 = pneg %p578_p10 }
  0x24   : > { %p586_p8 = pnand %p585_p4, %p579_p1 }
  0x26   : > { %589 = shalt.err (!%p586_p8)
}
  0x27   : > { %s693_s8 = smov 128   ;;  %s694_s9 = smov 8  }
  0x28   : > { %503 = dma.hbm_to_vmem [thread:$0]  (!%p773_p11), %s953_s1, 512, %s766_s22, [#allocation6], %s693_s8, %s693_s8, %s694_s9  }
  0x29   : > { %p25_p1 = scmp.eq.s32.totalorder %s24_s26, 0  ;;  %p34_p2 = scmp.ne.s32.totalorder %s686_s14, %s682_s13 }
  0x2a   : > { %p35_p4 = scmp.eq.s32.totalorder %s690_s15, 0  ;;  %p513_p6 = scmp.lt.s32.totalorder %s690_s15, 2 }
  0x2b   : > { %s812_s17 = scalar_select %p25_p1, %s686_s14, %s27_s25  }
  0x2c   : > { %p36_p8 = por %p35_p4, %p34_p2  ;;  %p963_p10 = scmp.eq.s32.totalorder %s743_s16, 1 }
  0x2d   : > { %s148_s23 = sand.u32 1, %s686_s14   ;;  %s452_s27 = smul.u32 384, %s690_s15 }
  0x2e   : > { %p816_p12 = por %p963_p10, %p34_p2  ;;  %s490_s28 = smul.u32 24, %s148_s23 }
  0x2f   : > { %p822_p13 = pnand %p513_p6, %p36_p8  ;;  %s829_s25 = scalar_lea.hbm %s952_s0, %s452_s27 }
  0x30   : > { %s152_s30 = scalar_lea.vmem [#allocation2], %s490_s28  ;;  %s833_s5 = scalar_lea.sflag [#allocation3], %s148_s23 }
  0x31   : > { %s159_s4 = sshll.u32 %s152_s30, 4  ;;  %s590_s6 = scalar_lea.hbm %s829_s25, 384  ;;  %s831_s4 = int_to_ptr.vmem [resolvable:$true] %s159_s4 }
  0x32   : > { %p591_p11 = scmp.ne.s32.totalorder %s829_s25, %s590_s6  ;;  %p592_p0 = pneg %p822_p13 }
  0x33   : > { %s595_s11 = scalar_lea.hbm %s952_s0, 768  ;;  %p596_p7 = scmp.lt.u32.totalorder %s829_s25, %s952_s0 }
  0x34   : > { %p593_p3 = pnand %p592_p0, %p591_p11  ;;  %p597_p9 = scmp.lt.u32.totalorder %s595_s11, %s590_s6 }
  0x35   : > { %p599_p2 = scmp.lt.u32.totalorder %s590_s6, %s829_s25 }
  0x36   : > { %p594_p5 = pneg %p593_p3  ;;  %p598_p1 = por %p597_p9, %p596_p7 }
  0x38   : > { %p600_p4 = por %p599_p2, %p598_p1 }
  0x3a   : > { %p601_p6 = pnand %p600_p4, %p594_p5 }
  0x3c   : > { %604 = shalt.err (!%p601_p6)
}
  0x3d   : > { %s605_s23 = scalar_lea.vmem %s831_s4, 384  ;;  %s695_s28 = smov [#allocation2]  }
  0x3e   : > { %p606_p8 = scmp.ne.s32.totalorder %s831_s4, %s605_s23  ;;  %s610_s26 = sshll.u32 %s695_s28, 4  ;;  %s611_s26 = int_to_ptr.vmem [resolvable:$false] %s610_s26 }
  0x3f   : > { %s612_s30 = scalar_lea.vmem %s611_s26, 768  ;;  %p613_p3 = scmp.lt.s32.totalorder %s831_s4, %s611_s26 }
  0x40   : > { %p608_p10 = pnand %p606_p8, %p592_p0  ;;  %p614_p7 = scmp.lt.s32.totalorder %s612_s30, %s605_s23 }
  0x42   : > { %p609_p11 = pneg %p608_p10  ;;  %p615_p9 = por %p614_p7, %p613_p3 }
  0x44   : > { %p616_p1 = pnand %p615_p9, %p609_p11 }
  0x46   : > { %619 = shalt.err (!%p616_p1)
}
  0x47   : > { %507 = dma.hbm_to_vmem [thread:$0]  (!%p822_p13), %s829_s25, 384, %s831_s4, %s833_s5, %s693_s8, %s693_s8, %s694_s9  }
  0x48   : > { %p966_p0 = scmp.ne.s32.totalorder %s961_s20, 0 }
  0x49   : > { %s867_s6 = sand.u32 (!%p966_p0), 1, %s682_s13   ;;  %p967_p5 = scmp.ne.s32.totalorder (!%p966_p0), %s959_s18, 0 }
  0x4a   : > { %171 = sbr.rel (%p966_p0) target bundleno = 353 (0x161), region = 32  ;;  %s174_s10 = scalar_lea.sflag (!%p966_p0), [#allocation3], %s867_s6 }
  0x4b   : > { %s491_s7 = smul.u32 (!%p966_p0), 24, %s867_s6 }
  0x4d   : > { %s873_s29 = scalar_lea.vmem (!%p966_p0), [#allocation2], %s491_s7 }
  0x51   : > { %665 = dma.done.wait (%p967_p5), %s174_s10, 384  }
  0x52   : > { %667 = vsyncadd (%p967_p5), %s174_s10, 4294966912  ;;  %p968_p13 = scmp.eq.s32.totalorder %s743_s16, 0 }
  0x54   : > { %669 = dma.done.wait (%p968_p13), [#allocation6], 512   ;;  %p969_p2 = pmov %p968_p13 }
  0x55   : > { %v696_v0 = vmov 0.0|0.0   ;;  %vm697_vm0 = vmmov 0   ;;  %v698_v1 = vmov 0.0   ;;  %vm220_vm1 = vcmask 261120   ;;  %v209_v2 = vld [vmem:[#allocation5] sm:$0xff]  ;;  %v210_v3 = vld [vmem:[#allocation5 + $0x8] sm:$0xff] }
  0x56   : > { %671 = vsyncadd (%p969_p2), [#allocation6], 4294966784  ;;  %486 = vmatprep.subr.bf16.mxu1 %v696_v0  ;;  %478 = vmatprep.subr.bf16.mxu0 %v696_v0  ;;  %v479_v4 = vpack.c.bf16 %v210_v3, %v209_v2  ;;  %v211_v5 = vld [vmem:[#allocation5 + $0x10] sm:$0xff]  ;;  %v212_v6 = vld [vmem:[#allocation5 + $0x18] sm:$0xff]  ;;  %s453_s8 = smul.u32 384, %s743_s16  ;;  %s203_s9 = scalar_lea.vmem [#allocation7], %s491_s7 }
  0x57   : > { %472 = vmatprep.mubr.msk.f32.mxu1 %vm697_vm0, %v698_v1  ;;  %469 = vmatprep.mubr.msk.f32.mxu0 %vm697_vm0, %v698_v1  ;;  %vm480_vm2 = vmpackc.low %vm220_vm1, %vm220_vm1  ;;  %v483_v7 = vpack.c.bf16 %v212_v6, %v211_v5  ;;  %v207_v8 = vld [vmem:[%s873_s29 + $0x8] sm:$0xff]  ;;  %v206_v9 = vld [vmem:[%s873_s29] sm:$0xff]  ;;  %s351_s25 = sshll.u32 %s203_s9, 4  ;;  %s338_s16 = scalar_lea.sflag [#allocation4], %s867_s6  ;;  %s907_s25 = int_to_ptr.vmem [resolvable:$true] %s351_s25 }
  0x58   : > { %488 = vmatpush3.bf16.xpose.msk.msra.mxu1 %vm480_vm2, %v479_v4  ;;  %481 = vmatpush3.bf16.xpose.msk.msra.mxu0 %vm480_vm2, %v479_v4  ;;  %v208_v10 = vld [vmem:[%s873_s29 + $0x10] sm:$0xff]  ;;  %v441_v11 = vld [vmem:[%s954_s2] ss:$0 sm:$0xff]  ;;  %s905_s11 = scalar_lea.hbm %s955_s3, %s453_s8  ;;  %s620_s27 = scalar_lea.vmem %s907_s25, 384 }
  0x59   : > { %487 = vmatprep.subr.bf16.mxu1 %v696_v0  ;;  %482 = vmatprep.subr.bf16.mxu0 %v696_v0  ;;  %p621_p4 = scmp.ne.s32.totalorder %s907_s25, %s620_s27  ;;  %s699_s22 = smov [#allocation7]  }
  0x5a   : > { %s624_s23 = sshll.u32 %s699_s22, 4  ;;  %s625_s23 = int_to_ptr.vmem [resolvable:$false] %s624_s23 }
  0x5b   : > { %p622_p6 = pnand %p621_p4, %p816_p12  ;;  %s626_s28 = scalar_lea.vmem %s625_s23, 768 }
  0x5c   : > { %p627_p10 = scmp.lt.s32.totalorder %s907_s25, %s625_s23  ;;  %p628_p11 = scmp.lt.s32.totalorder %s626_s28, %s620_s27 }
  0x5d   : > { %p623_p8 = pneg %p622_p6 }
  0x5e   : > { %p629_p3 = por %p628_p11, %p627_p10 }
  0x60   : > { %489 = vmatpush3.bf16.xpose.msk.msra.mxu1 %vm480_vm2, %v483_v7  ;;  %485 = vmatpush3.bf16.xpose.msk.msra.mxu0 %vm480_vm2, %v483_v7  ;;  %p630_p7 = pnand %p629_p3, %p623_p8 }
  0x67   : > { %473 = vmatmul.mubr.msk.f32.vlgmr.msra.gmra.mrb[0].mxu1 %vm220_vm1, %v207_v8  ;;  %470 = vmatmul.mubr.msk.f32.vlgmr.msra.gmra.mrb[0].mxu0 %vm220_vm1, %v206_v9 }
  0x68   : > { %475 = vmatprep.mubr.msk.f32.mxu1 %vm697_vm0, %v698_v1 }
  0x6b   : > { %476 = vmatmul.mubr.msk.f32.gmra.mrb[2].mxu1 %vm220_vm1, %v208_v10 }
 0x13a   : > { %v313_v12 = vpop.f32.mrb[0].mxu1  ;;  %v308_v13 = vpop.f32.mrb[0].mxu0 }
 0x13b   : > { %v314_v14 = vadd.f32 %v441_v11, %v313_v12  ;;  %v474_v15 = vpop.f32.mrb[1].mxu1  ;;  %v309_v16 = vadd.f32 %v441_v11, %v308_v13  ;;  %v471_v17 = vpop.f32.mrb[1].mxu0 }
 0x13d   : > { %v323_v18 = vmax.f32 %v314_v14, 0.0  ;;  %v322_v19 = vmax.f32 %v309_v16, 0.0 }
 0x13e   : > { %v318_v20 = vpop.f32.mrb[2].mxu1 }
 0x13f   : > { %v326_v21 = vsub.f32 0.0, %v323_v18  ;;  %v325_v22 = vsub.f32 0.0, %v322_v19  ;;  %v319_v23 = vadd.f32 %v441_v11, %v318_v20  ;;  %v477_v24 = vpop.f32.mrb[3].mxu1 }
 0x141   : > { %v330_v25 = vmul.f32 1.442695, %v326_v21  ;;  %v328_v26 = vmul.f32 1.442695, %v325_v22  ;;  %v324_v27 = vmax.f32 %v319_v23, 0.0 }
 0x143   : > { %556 = vpow2.f32 %v330_v25  ;;  %v327_v28 = vsub.f32 0.0, %v324_v27 }
 0x144   : > { %558 = vpow2.f32 %v328_v26 }
 0x145   : > { %v332_v29 = vmul.f32 1.442695, %v327_v28 }
 0x147   : > { %560 = vpow2.f32 %v332_v29 }
 0x14d   : > { %v557_v30 = vpop.eup %556 }
 0x14e   : > { %v559_v31 = vpop.eup %558  ;;  %335 = vst.msk [vmem:[%s203_s9 + $0x8] sm:$0xff] %vm220_vm1, %v557_v30 }
 0x14f   : > { %334 = vst.msk [vmem:[%s203_s9] sm:$0xff] %vm220_vm1, %v559_v31 }
 0x151   : > { %v561_v32 = vpop.eup %560 }
 0x152   : > { %336 = vst.msk [vmem:[%s203_s9 + $0x10] sm:$0xff] %vm220_vm1, %v561_v32 }
 0x153   : > { %633 = shalt.err (!%p630_p7)
}
 0x154   : > { %s634_s26 = scalar_lea.hbm %s905_s11, 384  ;;  %s638_s10 = scalar_lea.hbm %s955_s3, 768 }
 0x155   : > { %p635_p9 = scmp.ne.s32.totalorder %s905_s11, %s634_s26  ;;  %p639_p5 = scmp.lt.u32.totalorder %s905_s11, %s955_s3 }
 0x156   : > { %p640_p13 = scmp.lt.u32.totalorder %s638_s10, %s634_s26  ;;  %p642_p4 = scmp.lt.u32.totalorder %s634_s26, %s905_s11 }
 0x157   : > { %p636_p1 = pnand %p635_p9, %p816_p12 }
 0x158   : > { %p641_p2 = por %p640_p13, %p639_p5 }
 0x159   : > { %p637_p0 = pneg %p636_p1 }
 0x15a   : > { %p643_p6 = por %p642_p4, %p641_p2 }
 0x15c   : > { %p644_p8 = pnand %p643_p6, %p637_p0 }
 0x15e   : > { %647 = shalt.err (!%p644_p8)
}
 0x15f   : > { %s700_s20 = smov 128   ;;  %s701_s8 = smov 8  }
 0x160   : > { %498 = dma.vmem_to_hbm [thread:$0]  (%p816_p12), %s907_s25, 384, %s905_s11, %s338_s16, %s700_s20, %s700_s20, %s701_s8  }
 0x161 PF: > { %s366_s9 = sand.u32 1, %s678_s12   ;;  %p970_p10 = scmp.ne.s32.totalorder %s960_s19, 0 }
 0x162   : > { %p971_p11 = scmp.ge.s32.totalorder %s690_s15, 2  ;;  %s367_s4 = scalar_lea.sflag [#allocation4], %s366_s9 }
 0x164   : > { %p509_p3 = pnand %p971_p11, %p970_p10 }
 0x166   : > { %673 = dma.done.wait (!%p509_p3), %s367_s4, 384  }
 0x167   : > { %675 = vsyncadd (!%p509_p3), %s367_s4, 4294966912  ;;  %p17_p7 = scmp.ge.s32.totalorder %s778_s24, 4   ;;  %s972_s12 = smov %s682_s13 }
 0x168   : > { %s973_s13 = smov %s686_s14  ;;  %s974_s14 = smov %s812_s17 }
 0x169   : > { %s975_s15 = smov %s778_s24  ;;  %19 = sbr.rel (!%p17_p7) target bundleno = 6 (0x6), region = 81 }
 0x170   :  { %372 = vsyncpa [#allocation3], 1 }
 0x171   :  { %374 = vsyncpa [#allocation3 + $0x1], 1 }
 0x172   :  { %375 = vsyncpa [#allocation6], 1 }
 0x173   :  { %376 = vsyncpa [#allocation4], 1 }
 0x174   :  { %378 = vsyncpa [#allocation4 + $0x1], 1 }

</bundles_post_ra>
